<compile_context>
chip_gen: v5e
topology: v5e:2x2
jax: 0.10.0
libtpu: 0.0.40
codegen_flags: <defaults>
</compile_context>

<pallas_src>
import math
from functools import partial

import jax
import jax.numpy as jnp
from jax.experimental import pallas as pl
from jax.experimental.pallas import tpu as pltpu


def _tpu_defaults():
    """(vmem_limit_bytes, row_tile_target, col_tile_target) picked per TPU generation."""
    try:
        info = pltpu.get_tpu_info()
        cap = int(getattr(info, "vmem_capacity_bytes", 64 * 1024 * 1024))
    except Exception:  # pragma: no cover - conservative fallback
        cap = 64 * 1024 * 1024
    if cap >= 100 * 1024 * 1024:          # v5e / v6e: 128 MiB physical VMEM
        return 96 * 1024 * 1024, 512, 512
    return 48 * 1024 * 1024, 256, 256      # v7x: 64 MiB physical VMEM


_VMEM_LIMIT, _TM_TARGET, _TF_TARGET = _tpu_defaults()
_TK_TARGET = 512                           # attention / out-proj reduction tile target


def _divisor_tile(dim, target, align):
    """Largest multiple of `align` that divides `dim` and is <= target (else the full dim).

    NOTE: falls back to the full dimension when no aligned divisor exists (fine for the demo
    shapes; real deployments should pad T / linear_units to multiples of 8*align/128)."""
    if dim <= target:
        return dim
    t = (target // align) * align
    while t >= align:
        if dim % t == 0:
            return t
        t -= align
    return dim


def _cparams(sem):
    return pltpu.CompilerParams(dimension_semantics=sem, vmem_limit_bytes=_VMEM_LIMIT)


# ------------------- fused RMSNorm + grouped QKV projection (+RoPE) -------------------

def _norm_qkv_kernel(x_ref, nw_ref, w_ref, cos_ref, sin_ref, oq_ref, ok_ref, ov_ref, xn_ref,
                     *, eps, group, D, half, use_roll):
    j = pl.program_id(2)

    @pl.when(j == 0)   # RMSNorm1 computed once per row tile, reused for every kv-group
    def _():
        x = x_ref[...].astype(jnp.float32)
        ms = jnp.mean(x * x, axis=-1, keepdims=True)
        xn = x * jax.lax.rsqrt(ms + eps) * (1.0 + nw_ref[...].astype(jnp.float32))
        xn_ref[...] = xn.astype(xn_ref.dtype)

    # one MXU matmul covering the whole GQA group: [q_0..q_{group-1} | k | v] columns
    y = jnp.dot(xn_ref[...], w_ref[...], preferred_element_type=jnp.float32)

    cos = cos_ref[...]          # (tm, D)  = [cos | cos]
    sin = sin_ref[...]          # (tm, D)  = [-sin | sin]  (sign folded)

    def rope(z):                # z: (tm, D) f32 ; out = [z1*c - z2*s, z1*s + z2*c]
        if use_roll:
            rot = pltpu.roll(z, half, axis=-1)                       # XLU slot, free-ish
        else:
            rot = jnp.concatenate([z[:, half:], z[:, :half]], axis=-1)
        return z * cos + rot * sin

    for g in range(group):      # Q heads of this kv-group (static, small)
        oq_ref[g] = rope(y[:, g * D:(g + 1) * D]).astype(oq_ref.dtype)
    ok_ref[...] = rope(y[:, group * D:(group + 1) * D]).astype(ok_ref.dtype)
    ov_ref[...] = y[:, (group + 1) * D:(group + 2) * D].astype(ov_ref.dtype)


def norm_qkv_proj(xs, norm_w, wqkv, cos_full, sin_signed, *, eps, n_q_head, n_kv_head, head_dim):
    B, T, H = xs.shape
    group = n_q_head // n_kv_head
    D = head_dim
    Wc = (group + 2) * D
    half = D // 2
    tm = _divisor_tile(T, _TM_TARGET, 16)     # bf16 outputs -> prefer multiples of 16
    nT = T // tm
    use_roll = (D % 128 == 0)                 # lane-aligned roll only on real head dims
    kernel = partial(_norm_qkv_kernel, eps=eps, group=group, D=D, half=half, use_roll=use_roll)
    return pl.pallas_call(
        kernel,
        out_shape=(jax.ShapeDtypeStruct((B, n_q_head, T, D), jnp.bfloat16),
                   jax.ShapeDtypeStruct((B, n_kv_head, T, D), jnp.bfloat16),
                   jax.ShapeDtypeStruct((B, n_kv_head, T, D), jnp.bfloat16)),
        grid=(B, nT, n_kv_head),
        in_specs=[
            pl.BlockSpec((None, tm, H), lambda b, i, j: (b, i, 0)),
            pl.BlockSpec((1, H), lambda b, i, j: (0, 0)),
            pl.BlockSpec((None, H, Wc), lambda b, i, j: (j, 0, 0)),
            pl.BlockSpec((tm, D), lambda b, i, j: (i, 0)),
            pl.BlockSpec((tm, D), lambda b, i, j: (i, 0)),
        ],
        out_specs=(
            pl.BlockSpec((None, group, tm, D), lambda b, i, j: (b, j, i, 0)),
            pl.BlockSpec((None, None, tm, D), lambda b, i, j: (b, j, i, 0)),
            pl.BlockSpec((None, None, tm, D), lambda b, i, j: (b, j, i, 0)),
        ),
        scratch_shapes=[pltpu.VMEM((tm, H), jnp.bfloat16)],
        compiler_params=_cparams(("parallel", "parallel", "arbitrary")),
    )(xs, norm_w.reshape(1, H), wqkv, cos_full, sin_signed)


# -------------------- causal flash attention (mask generated in-kernel) --------------------

def _flash_attn_kernel(q_ref, k_ref, v_ref, o_ref, m_ref, l_ref, acc_ref,
                       *, group, n_kv_head, tq, tk):
    qi = pl.program_id(1)
    ki = pl.program_id(2)

    @pl.when(ki == 0)
    def _():
        m_ref[...] = jnp.full_like(m_ref, -jnp.inf)
        l_ref[...] = jnp.zeros_like(l_ref)
        acc_ref[...] = jnp.zeros_like(acc_ref)

    q_start = qi * tq
    k_start = ki * tk

    @pl.when(k_start <= q_start + tq - 1)     # skip fully-masked causal KV tiles
    def _():
        q_pos = q_start + jax.lax.broadcasted_iota(jnp.int32, (tq, tk), 0)
        k_pos = k_start + jax.lax.broadcasted_iota(jnp.int32, (tq, tk), 1)
        mask = k_pos <= q_pos
        neg = jnp.float32(-1e30)

        for h in range(n_kv_head):            # static: K/V loaded from VMEM once per kv head
            k = k_ref[h]                      # (tk, D) bf16
            v = v_ref[h]                      # (tk, D) bf16

            def body(gl, carry):
                g = h * group + gl
                q = q_ref[g]                  # (tq, D) bf16, softmax scale folded into Wq
                s = jax.lax.dot_general(q, k, (((1,), (1,)), ((), ())),
                                        preferred_element_type=jnp.float32)
                s = jnp.where(mask, s, neg)
                m_prev = m_ref[g]
                m_new = jnp.maximum(m_prev, jnp.max(s, axis=-1, keepdims=True))
                alpha = jnp.exp(m_prev - m_new)
                p = jnp.exp(s - m_new)
                l_ref[g] = alpha * l_ref[g] + jnp.sum(p, axis=-1, keepdims=True)
                acc_ref[g] = alpha * acc_ref[g] + jnp.dot(
                    p.astype(jnp.bfloat16), v, preferred_element_type=jnp.float32)
                m_ref[g] = m_new
                return carry

            jax.lax.fori_loop(0, group, body, None, unroll=True)

    @pl.when(ki == pl.num_programs(2) - 1)
    def _():
        l = l_ref[...]
        inv = pl.reciprocal(jnp.where(l == 0.0, 1.0, l), approx=True)   # (hq, tq, 1)
        n_heads = group * n_kv_head
        parts = [(acc_ref[g] * inv[g]).astype(o_ref.dtype) for g in range(n_heads)]
        o_ref[...] = jnp.concatenate(parts, axis=-1)                    # one lane-dense store


def flash_attention(q, k, v, *, n_kv_head):
    """q: (B, hq, T, D) bf16; k, v: (B, hkv, T, D) bf16 -> (B, T, hq*D) bf16 (causal)."""
    B, hq, T, D = q.shape
    group = hq // n_kv_head
    tq = _divisor_tile(T, _TK_TARGET, 16)
    tk = _divisor_tile(T, _TK_TARGET, 128)
    nQ, nK = T // tq, T // tk
    kernel = partial(_flash_attn_kernel, group=group, n_kv_head=n_kv_head, tq=tq, tk=tk)
    return pl.pallas_call(
        kernel,
        out_shape=jax.ShapeDtypeStruct((B, T, hq * D), jnp.bfloat16),
        grid=(B, nQ, nK),
        in_specs=[
            pl.BlockSpec((None, hq, tq, D), lambda b, qi, ki: (b, 0, qi, 0)),
            pl.BlockSpec((None, n_kv_head, tk, D), lambda b, qi, ki: (b, 0, ki, 0)),
            pl.BlockSpec((None, n_kv_head, tk, D), lambda b, qi, ki: (b, 0, ki, 0)),
        ],
        out_specs=pl.BlockSpec((None, tq, hq * D), lambda b, qi, ki: (b, qi, 0)),
        scratch_shapes=[pltpu.VMEM((hq, tq, 1), jnp.float32),
                        pltpu.VMEM((hq, tq, 1), jnp.float32),
                        pltpu.VMEM((hq, tq, D), jnp.float32)],
        compiler_params=_cparams(("parallel", "parallel", "arbitrary")),
    )(q, k, v)


# ----------------- attention output projection (plain GEMM + fused residual) -----------------

def _attn_out_kernel(a_ref, w_ref, r_ref, o_ref, acc_ref):
    k = pl.program_id(1)

    @pl.when(k == 0)
    def _():
        acc_ref[...] = jnp.zeros_like(acc_ref)

    acc_ref[...] += jnp.dot(a_ref[...], w_ref[...], preferred_element_type=jnp.float32)

    @pl.when(k == pl.num_programs(1) - 1)
    def _():
        o_ref[...] = (acc_ref[...] + r_ref[...].astype(jnp.float32)).astype(o_ref.dtype)


def attn_out_proj(attn, wo, resid):
    """attn: (B, T, hq*D) bf16, wo: (hq*D, H) bf16, resid: (B, T, H) f32 -> (B, T, H) f32."""
    B, T, C = attn.shape
    H = resid.shape[-1]
    R = B * T
    a2 = attn.reshape(R, C)
    r2 = resid.reshape(R, H)
    tm = _divisor_tile(R, _TM_TARGET, 16)
    tko = _divisor_tile(C, _TK_TARGET, 128)
    out = pl.pallas_call(
        _attn_out_kernel,
        out_shape=jax.ShapeDtypeStruct((R, H), resid.dtype),
        grid=(R // tm, C // tko),
        in_specs=[pl.BlockSpec((tm, tko), lambda i, k: (i, k)),
                  pl.BlockSpec((tko, H), lambda i, k: (k, 0)),
                  pl.BlockSpec((tm, H), lambda i, k: (i, 0))],
        out_specs=pl.BlockSpec((tm, H), lambda i, k: (i, 0)),
        scratch_shapes=[pltpu.VMEM((tm, H), jnp.float32)],
        compiler_params=_cparams(("parallel", "arbitrary")),
    )(a2, wo, r2)
    return out.reshape(B, T, H)


# ------------- fused RMSNorm + gated MLP (+ residual, optional fused final norm) -------------

def _norm_mlp_kernel(x_ref, nw_ref, wg_ref, wu_ref, wd_ref, fw_ref, o_ref, xn_ref, acc_ref,
                     *, eps, fuse_final, approx_gelu):
    f = pl.program_id(1)

    @pl.when(f == 0)
    def _():
        x = x_ref[...].astype(jnp.float32)
        ms = jnp.mean(x * x, axis=-1, keepdims=True)
        xn = x * jax.lax.rsqrt(ms + eps) * (1.0 + nw_ref[...].astype(jnp.float32))
        xn_ref[...] = xn.astype(xn_ref.dtype)
        acc_ref[...] = jnp.zeros_like(acc_ref)

    xn = xn_ref[...]
    g = jnp.dot(xn, wg_ref[...], preferred_element_type=jnp.float32)
    u = jnp.dot(xn, wu_ref[...], preferred_element_type=jnp.float32)
    hidden = jax.nn.gelu(g, approximate=approx_gelu) * u          # gate stats in f32
    acc_ref[...] += jnp.dot(hidden.astype(wd_ref.dtype), wd_ref[...],
                            preferred_element_type=jnp.float32)

    @pl.when(f == pl.num_programs(1) - 1)
    def _():
        y = acc_ref[...] + x_ref[...].astype(jnp.float32)         # residual
        if fuse_final:                                            # last layer: fused final RMSNorm
            ms = jnp.mean(y * y, axis=-1, keepdims=True)
            y = y * jax.lax.rsqrt(ms + eps) * (1.0 + fw_ref[...].astype(jnp.float32))
        o_ref[...] = y.astype(o_ref.dtype)


def norm_gated_mlp(xs, norm_w, wg, wu, wd, *, eps, approx_gelu, final_norm_w=None):
    B, T, H = xs.shape
    F = wg.shape[1]
    R = B * T
    x2 = xs.reshape(R, H)
    tm = _divisor_tile(R, _TM_TARGET, 16)
    tf = _divisor_tile(F, _TF_TARGET, 128)
    fuse_final = final_norm_w is not None
    fw = (final_norm_w if fuse_final else jnp.zeros((H,), jnp.float32)).reshape(1, H)
    out = pl.pallas_call(
        partial(_norm_mlp_kernel, eps=eps, fuse_final=fuse_final, approx_gelu=approx_gelu),
        out_shape=jax.ShapeDtypeStruct((R, H), xs.dtype),
        grid=(R // tm, F // tf),
        in_specs=[
            pl.BlockSpec((tm, H), lambda i, f: (i, 0)),
            pl.BlockSpec((1, H), lambda i, f: (0, 0)),
            pl.BlockSpec((H, tf), lambda i, f: (0, f)),
            pl.BlockSpec((H, tf), lambda i, f: (0, f)),
            pl.BlockSpec((tf, H), lambda i, f: (f, 0)),
            pl.BlockSpec((1, H), lambda i, f: (0, 0)),
        ],
        out_specs=pl.BlockSpec((tm, H), lambda i, f: (i, 0)),
        scratch_shapes=[pltpu.VMEM((tm, H), jnp.bfloat16),
                        pltpu.VMEM((tm, H), jnp.float32)],
        compiler_params=_cparams(("parallel", "arbitrary")),
    )(x2, norm_w.reshape(1, H), wg, wu, wd, fw)
    return out.reshape(B, T, H)


# ------------------------------------- model glue -------------------------------------

def init_params(key, cfg):
    H, F = cfg["hidden_size"], cfg["linear_units"]
    hq, hkv, hd = cfg["attention_heads"], cfg["n_kv_head"], cfg["head_dim"]
    group = hq // hkv
    qk_scale = 1.0 / math.sqrt(hd)          # softmax scale folded into Wq (RoPE is linear)

    def nrm(k, shape, s=0.02, dtype=jnp.bfloat16):
        return (s * jax.random.normal(k, shape, jnp.float32)).astype(dtype)

    layers = []
    for i in range(cfg["num_blocks"]):
        ks = jax.random.split(jax.random.fold_in(key, i), 9)
        wq = (nrm(ks[2], (hq, H, hd)).astype(jnp.float32) * qk_scale).astype(jnp.bfloat16)
        wk = nrm(ks[3], (hkv, H, hd))
        wv = nrm(ks[4], (hkv, H, hd))
        # grouped QKV weight: for kv-head j, columns = [Q heads j*group..(j+1)*group | K_j | V_j]
        wqkv = jnp.stack([
            jnp.concatenate([wq[j * group + g] for g in range(group)] + [wk[j], wv[j]], axis=-1)
            for j in range(hkv)], axis=0)                          # (hkv, H, (group+2)*hd)
        wo = nrm(ks[5], (hq, hd, H)).reshape(hq * hd, H)           # head-major rows -> (hq*hd, H)
        layers.append(dict(
            norm1=nrm(ks[0], (H,), 0.1, jnp.float32),
            norm2=nrm(ks[1], (H,), 0.1, jnp.float32),
            wqkv=wqkv, wo=wo,
            w_gate=nrm(ks[6], (H, F)), w_up=nrm(ks[7], (H, F)), w_down=nrm(ks[8], (F, H)),
        ))
    final_norm = nrm(jax.random.fold_in(key, 10_000), (H,), 0.1, jnp.float32)
    return dict(layers=layers, final_norm=final_norm)


def decoder_only_forward(params, x, att_mask, cfg, input_position=0):
    """x: (B, T, H) float32, att_mask: (B, T, T) bool (causal). Returns (xs, kv_caches)."""
    B, T, H = x.shape
    hq, hkv, hd = cfg["attention_heads"], cfg["n_kv_head"], cfg["head_dim"]
    eps = cfg["norm_eps"]
    approx_gelu = cfg.get("gelu_approximate") == "tanh"

    # TODO(synk): attention mask is generated in-kernel assuming a causal pattern (matches the
    # decoder-only use case); arbitrary att_mask patterns would need a streamed-mask variant.
    del att_mask
    # TODO(synk): dropout layers are stochastic (training only) -> identity here (eval semantics).
    # TODO(synk): incremental decode (concatenating an existing kv_cache prefix) not implemented.

    xs = x * jnp.float32(math.sqrt(H)) if cfg["scale_embed"] else x

    # RoPE tables (google-style half-split), sign folded into sin: out = y*cos + swap(y)*sin.
    inv_freq = 1.0 / (cfg["rope_theta"] ** (jnp.arange(0, hd, 2, dtype=jnp.float32) / hd))
    pos = jnp.arange(input_position, input_position + T, dtype=jnp.float32)
    ang = jnp.outer(pos, inv_freq)                                  # (T, hd//2)
    cos_full = jnp.concatenate([jnp.cos(ang), jnp.cos(ang)], axis=-1)      # (T, hd)
    sin_signed = jnp.concatenate([-jnp.sin(ang), jnp.sin(ang)], axis=-1)   # (T, hd)

    n_layers = len(params["layers"])
    new_kv_caches = []
    for li, lp in enumerate(params["layers"]):
        # --- self-attention sublayer (pre-norm); RoPE + scale folded into the QKV kernel ---
        q, k, v = norm_qkv_proj(xs, lp["norm1"], lp["wqkv"], cos_full, sin_signed,
                                eps=eps, n_q_head=hq, n_kv_head=hkv, head_dim=hd)
        attn = flash_attention(q, k, v, n_kv_head=hkv)              # (B, T, hq*hd) bf16, causal
        xs = attn_out_proj(attn, lp["wo"], xs)                      # residual fused
        new_kv_caches.append((k, v))                                # rotated K + V, cache layout

        # --- gated MLP sublayer (pre-norm), residual fused; final norm fused on last layer ---
        fw = params["final_norm"] if li == n_layers - 1 else None
        xs = norm_gated_mlp(xs, lp["norm2"], lp["w_gate"], lp["w_up"], lp["w_down"],
                            eps=eps, approx_gelu=approx_gelu, final_norm_w=fw)
    return xs, new_kv_caches


# ----------------------------------------- main -----------------------------------------

if __name__ == "__main__":
    cfg = dict(
        hidden_size=32,
        attention_heads=4,
        n_kv_head=2,
        head_dim=16,
        linear_units=64,
        num_blocks=2,
        norm_eps=1e-5,
        rope_theta=10000.0,
        scale_embed=True,
        gelu_approximate="tanh",
    )
    B, T = 2, 8

    key = jax.random.PRNGKey(0)
    k_param, k_x = jax.random.split(key)
    params = init_params(k_param, cfg)

    x = jax.random.normal(k_x, (B, T, cfg["hidden_size"]), jnp.float32)
    att_mask = jnp.broadcast_to(jnp.tril(jnp.ones((T, T), dtype=bool)), (B, T, T))

    xs, kv_caches = decoder_only_forward(params, x, att_mask, cfg, input_position=0)
    jax.block_until_ready(xs)
    for kc, vc in kv_caches:
        jax.block_until_ready(kc)
        jax.block_until_ready(vc)

    assert xs.shape == (B, T, cfg["hidden_size"])
    assert len(kv_caches) == cfg["num_blocks"]
    assert kv_caches[0][0].shape == (B, cfg["n_kv_head"], T, cfg["head_dim"])
    assert bool(jnp.all(jnp.isfinite(xs)))
    print("KERNEL_OK")
</pallas_src>

<mosaic_0001>
module attributes {stable_mosaic.version = 11 : i64} {
  func.func @_norm_qkv_kernel(%arg0: i32, %arg1: i32, %arg2: i32, %arg3: memref<1x8x32xf32, #tpu.memory_space<vmem>>, %arg4: memref<1x32xf32, #tpu.memory_space<vmem>>, %arg5: memref<1x32x64xbf16, #tpu.memory_space<vmem>>, %arg6: memref<8x16xf32, #tpu.memory_space<vmem>>, %arg7: memref<8x16xf32, #tpu.memory_space<vmem>>, %arg8: memref<1x2x8x16xbf16, #tpu.memory_space<vmem>>, %arg9: memref<1x1x8x16xbf16, #tpu.memory_space<vmem>>, %arg10: memref<1x1x8x16xbf16, #tpu.memory_space<vmem>>, %arg11: memref<8x32xbf16, #tpu.memory_space<vmem>>) attributes {dimension_semantics = [#tpu.dimension_semantics<parallel>, #tpu.dimension_semantics<parallel>, #tpu.dimension_semantics<arbitrary>], iteration_bounds = array<i64: 2, 1, 2>, scalar_prefetch = 0 : i64, scratch_operands = 1 : i64, tpu.core_type = #tpu.core_type<tc>, window_params = [{transform_indices = @transform_0, window_bounds = array<i64: 1, 8, 32>}, {pipeline_mode = #tpu.pipeline_mode<synchronous>, transform_indices = @transform_1, window_bounds = array<i64: 1, 32>}, {transform_indices = @transform_2, window_bounds = array<i64: 1, 32, 64>}, {transform_indices = @transform_3, window_bounds = array<i64: 8, 16>}, {transform_indices = @transform_4, window_bounds = array<i64: 8, 16>}, {transform_indices = @transform_5, window_bounds = array<i64: 1, 2, 8, 16>}, {transform_indices = @transform_6, window_bounds = array<i64: 1, 1, 8, 16>}, {transform_indices = @transform_7, window_bounds = array<i64: 1, 1, 8, 16>}]} {
    %c0_i32 = arith.constant 0 : i32
    %0 = arith.cmpi eq, %arg2, %c0_i32 : i32
    %1 = arith.extui %0 : i1 to i32
    %c0_i32_0 = arith.constant 0 : i32
    %2 = arith.cmpi ne, %1, %c0_i32_0 : i32
    scf.if %2 {
      %c0_24 = arith.constant 0 : index
      %c0_25 = arith.constant 0 : index
      %c0_26 = arith.constant 0 : index
      %47 = vector.load %arg3[%c0_24, %c0_25, %c0_26] : memref<1x8x32xf32, #tpu.memory_space<vmem>>, vector<1x8x32xf32>
      %48 = vector.shape_cast %47 : vector<1x8x32xf32> to vector<8x32xf32>
      %49 = arith.mulf %48, %48 : vector<8x32xf32>
      %cst_27 = arith.constant dense<0.000000e+00> : vector<8xf32>
      %50 = vector.multi_reduction <add>, %49, %cst_27 [1] : vector<8x32xf32> to vector<8xf32>
      %51 = vector.shape_cast %50 : vector<8xf32> to vector<8x1xf32>
      %cst_28 = arith.constant 3.200000e+01 : f32
      %52 = vector.broadcast %cst_28 : f32 to vector<8x1xf32>
      %53 = arith.divf %51, %52 : vector<8x1xf32>
      %cst_29 = arith.constant 9.99999974E-6 : f32
      %54 = vector.broadcast %cst_29 : f32 to vector<8x1xf32>
      %55 = arith.addf %53, %54 : vector<8x1xf32>
      %56 = math.rsqrt %55 : vector<8x1xf32>
      %57 = vector.broadcast %56 : vector<8x1xf32> to vector<8x32xf32>
      %58 = arith.mulf %48, %57 : vector<8x32xf32>
      %c0_30 = arith.constant 0 : index
      %c0_31 = arith.constant 0 : index
      %59 = vector.load %arg4[%c0_30, %c0_31] : memref<1x32xf32, #tpu.memory_space<vmem>>, vector<1x32xf32>
      %cst_32 = arith.constant 1.000000e+00 : f32
      %60 = vector.broadcast %cst_32 : f32 to vector<1x32xf32>
      %61 = arith.addf %60, %59 : vector<1x32xf32>
      %62 = vector.broadcast %61 : vector<1x32xf32> to vector<8x32xf32>
      %63 = arith.mulf %58, %62 : vector<8x32xf32>
      %64 = arith.truncf %63 : vector<8x32xf32> to vector<8x32xbf16>
      %c0_33 = arith.constant 0 : index
      %c0_34 = arith.constant 0 : index
      %65 = vector.load %arg11[%c0_33, %c0_34] : memref<8x32xbf16, #tpu.memory_space<vmem>>, vector<8x32xbf16>
      tpu.vector_store %arg11[%c0_33, %c0_34], %64 {strides = array<i32>} : memref<8x32xbf16, #tpu.memory_space<vmem>>, vector<8x32xbf16>,
    } else {
    }
    %c0 = arith.constant 0 : index
    %c0_1 = arith.constant 0 : index
    %3 = vector.load %arg11[%c0, %c0_1] : memref<8x32xbf16, #tpu.memory_space<vmem>>, vector<8x32xbf16>
    %c0_2 = arith.constant 0 : index
    %c0_3 = arith.constant 0 : index
    %c0_4 = arith.constant 0 : index
    %4 = vector.load %arg5[%c0_2, %c0_3, %c0_4] : memref<1x32x64xbf16, #tpu.memory_space<vmem>>, vector<1x32x64xbf16>
    %5 = vector.shape_cast %4 : vector<1x32x64xbf16> to vector<32x64xbf16>
    %cst = arith.constant dense<0.000000e+00> : vector<8x64xf32>
    %6 = tpu.matmul %3, %5, %cst {dimension_numbers = #tpu.dot_dimension_numbers<[1], [0], [0], [1], [0, 0, 1, 1], [], []>} : vector<8x32xbf16>, vector<32x64xbf16>, vector<8x64xf32> -> vector<8x64xf32>
    %c0_5 = arith.constant 0 : index
    %c0_6 = arith.constant 0 : index
    %7 = vector.load %arg6[%c0_5, %c0_6] : memref<8x16xf32, #tpu.memory_space<vmem>>, vector<8x16xf32>
    %c0_7 = arith.constant 0 : index
    %c0_8 = arith.constant 0 : index
    %8 = vector.load %arg7[%c0_7, %c0_8] : memref<8x16xf32, #tpu.memory_space<vmem>>, vector<8x16xf32>
    %9 = vector.extract_strided_slice %6 {offsets = [0, 0], sizes = [8, 16], strides = [1, 1]} : vector<8x64xf32> to vector<8x16xf32>
    %10 = vector.extract_strided_slice %9 {offsets = [0, 8], sizes = [8, 8], strides = [1, 1]} : vector<8x16xf32> to vector<8x8xf32>
    %11 = vector.extract_strided_slice %9 {offsets = [0, 0], sizes = [8, 8], strides = [1, 1]} : vector<8x16xf32> to vector<8x8xf32>
    %12 = tpu.concatenate %10, %11 in 1 : vector<8x8xf32>, vector<8x8xf32> -> vector<8x16xf32>
    %13 = arith.mulf %9, %7 : vector<8x16xf32>
    %14 = arith.mulf %12, %8 : vector<8x16xf32>
    %15 = arith.addf %13, %14 : vector<8x16xf32>
    %16 = arith.truncf %15 : vector<8x16xf32> to vector<8x16xbf16>
    %c0_9 = arith.constant 0 : index
    %c0_10 = arith.constant 0 : index
    %c0_11 = arith.constant 0 : index
    %c0_12 = arith.constant 0 : index
    %17 = vector.load %arg8[%c0_9, %c0_10, %c0_11, %c0_12] : memref<1x2x8x16xbf16, #tpu.memory_space<vmem>>, vector<1x1x8x16xbf16>
    %18 = vector.shape_cast %17 : vector<1x1x8x16xbf16> to vector<8x16xbf16>
    %19 = vector.shape_cast %16 : vector<8x16xbf16> to vector<1x1x8x16xbf16>
    tpu.vector_store %arg8[%c0_9, %c0_10, %c0_11, %c0_12], %19 {strides = array<i32>} : memref<1x2x8x16xbf16, #tpu.memory_space<vmem>>, vector<1x1x8x16xbf16>,
    %20 = vector.extract_strided_slice %6 {offsets = [0, 16], sizes = [8, 16], strides = [1, 1]} : vector<8x64xf32> to vector<8x16xf32>
    %21 = vector.extract_strided_slice %20 {offsets = [0, 8], sizes = [8, 8], strides = [1, 1]} : vector<8x16xf32> to vector<8x8xf32>
    %22 = vector.extract_strided_slice %20 {offsets = [0, 0], sizes = [8, 8], strides = [1, 1]} : vector<8x16xf32> to vector<8x8xf32>
    %23 = tpu.concatenate %21, %22 in 1 : vector<8x8xf32>, vector<8x8xf32> -> vector<8x16xf32>
    %24 = arith.mulf %20, %7 : vector<8x16xf32>
    %25 = arith.mulf %23, %8 : vector<8x16xf32>
    %26 = arith.addf %24, %25 : vector<8x16xf32>
    %27 = arith.truncf %26 : vector<8x16xf32> to vector<8x16xbf16>
    %c0_13 = arith.constant 0 : index
    %c1 = arith.constant 1 : index
    %c0_14 = arith.constant 0 : index
    %c0_15 = arith.constant 0 : index
    %28 = vector.load %arg8[%c0_13, %c1, %c0_14, %c0_15] : memref<1x2x8x16xbf16, #tpu.memory_space<vmem>>, vector<1x1x8x16xbf16>
    %29 = vector.shape_cast %28 : vector<1x1x8x16xbf16> to vector<8x16xbf16>
    %30 = vector.shape_cast %27 : vector<8x16xbf16> to vector<1x1x8x16xbf16>
    tpu.vector_store %arg8[%c0_13, %c1, %c0_14, %c0_15], %30 {strides = array<i32>} : memref<1x2x8x16xbf16, #tpu.memory_space<vmem>>, vector<1x1x8x16xbf16>,
    %31 = vector.extract_strided_slice %6 {offsets = [0, 32], sizes = [8, 16], strides = [1, 1]} : vector<8x64xf32> to vector<8x16xf32>
    %32 = vector.extract_strided_slice %31 {offsets = [0, 8], sizes = [8, 8], strides = [1, 1]} : vector<8x16xf32> to vector<8x8xf32>
    %33 = vector.extract_strided_slice %31 {offsets = [0, 0], sizes = [8, 8], strides = [1, 1]} : vector<8x16xf32> to vector<8x8xf32>
    %34 = tpu.concatenate %32, %33 in 1 : vector<8x8xf32>, vector<8x8xf32> -> vector<8x16xf32>
    %35 = arith.mulf %31, %7 : vector<8x16xf32>
    %36 = arith.mulf %34, %8 : vector<8x16xf32>
    %37 = arith.addf %35, %36 : vector<8x16xf32>
    %38 = arith.truncf %37 : vector<8x16xf32> to vector<8x16xbf16>
    %c0_16 = arith.constant 0 : index
    %c0_17 = arith.constant 0 : index
    %c0_18 = arith.constant 0 : index
    %c0_19 = arith.constant 0 : index
    %39 = vector.load %arg9[%c0_16, %c0_17, %c0_18, %c0_19] : memref<1x1x8x16xbf16, #tpu.memory_space<vmem>>, vector<1x1x8x16xbf16>
    %40 = vector.shape_cast %39 : vector<1x1x8x16xbf16> to vector<8x16xbf16>
    %41 = vector.shape_cast %38 : vector<8x16xbf16> to vector<1x1x8x16xbf16>
    tpu.vector_store %arg9[%c0_16, %c0_17, %c0_18, %c0_19], %41 {strides = array<i32>} : memref<1x1x8x16xbf16, #tpu.memory_space<vmem>>, vector<1x1x8x16xbf16>,
    %42 = vector.extract_strided_slice %6 {offsets = [0, 48], sizes = [8, 16], strides = [1, 1]} : vector<8x64xf32> to vector<8x16xf32>
    %43 = arith.truncf %42 : vector<8x16xf32> to vector<8x16xbf16>
    %c0_20 = arith.constant 0 : index
    %c0_21 = arith.constant 0 : index
    %c0_22 = arith.constant 0 : index
    %c0_23 = arith.constant 0 : index
    %44 = vector.load %arg10[%c0_20, %c0_21, %c0_22, %c0_23] : memref<1x1x8x16xbf16, #tpu.memory_space<vmem>>, vector<1x1x8x16xbf16>
    %45 = vector.shape_cast %44 : vector<1x1x8x16xbf16> to vector<8x16xbf16>
    %46 = vector.shape_cast %43 : vector<8x16xbf16> to vector<1x1x8x16xbf16>
    tpu.vector_store %arg10[%c0_20, %c0_21, %c0_22, %c0_23], %46 {strides = array<i32>} : memref<1x1x8x16xbf16, #tpu.memory_space<vmem>>, vector<1x1x8x16xbf16>,
    return
  }
  func.func @transform_0(%arg0: i32, %arg1: i32, %arg2: i32) -> (i32, i32, i32) {
    %c0_i32 = arith.constant 0 : i32
    %c0_i32_0 = arith.constant 0 : i32
    return %arg0, %arg1, %c0_i32 : i32, i32, i32
  }
  func.func @transform_1(%arg0: i32, %arg1: i32, %arg2: i32) -> (i32, i32) {
    %c0_i32 = arith.constant 0 : i32
    %c0_i32_0 = arith.constant 0 : i32
    %c0_i32_1 = arith.constant 0 : i32
    return %c0_i32, %c0_i32_0 : i32, i32
  }
  func.func @transform_2(%arg0: i32, %arg1: i32, %arg2: i32) -> (i32, i32, i32) {
    %c0_i32 = arith.constant 0 : i32
    %c0_i32_0 = arith.constant 0 : i32
    %c0_i32_1 = arith.constant 0 : i32
    return %arg2, %c0_i32, %c0_i32_0 : i32, i32, i32
  }
  func.func @transform_3(%arg0: i32, %arg1: i32, %arg2: i32) -> (i32, i32) {
    %c0_i32 = arith.constant 0 : i32
    %c0_i32_0 = arith.constant 0 : i32
    return %arg1, %c0_i32 : i32, i32
  }
  func.func @transform_4(%arg0: i32, %arg1: i32, %arg2: i32) -> (i32, i32) {
    %c0_i32 = arith.constant 0 : i32
    %c0_i32_0 = arith.constant 0 : i32
    return %arg1, %c0_i32 : i32, i32
  }
  func.func @transform_5(%arg0: i32, %arg1: i32, %arg2: i32) -> (i32, i32, i32, i32) {
    %c0_i32 = arith.constant 0 : i32
    %c0_i32_0 = arith.constant 0 : i32
    return %arg0, %arg2, %arg1, %c0_i32 : i32, i32, i32, i32
  }
  func.func @transform_6(%arg0: i32, %arg1: i32, %arg2: i32) -> (i32, i32, i32, i32) {
    %c0_i32 = arith.constant 0 : i32
    %c0_i32_0 = arith.constant 0 : i32
    return %arg0, %arg2, %arg1, %c0_i32 : i32, i32, i32, i32
  }
  func.func @transform_7(%arg0: i32, %arg1: i32, %arg2: i32) -> (i32, i32, i32, i32) {
    %c0_i32 = arith.constant 0 : i32
    %c0_i32_0 = arith.constant 0 : i32
    return %arg0, %arg2, %arg1, %c0_i32 : i32, i32, i32, i32
  }
}

</mosaic_0001>

<bundles_post_ra>
// kernel: tpu_custom_call.1
= control target key start
LH: loop header
LB: loop body
LE: loop exit
PB: predicated region body
PF: predicated region fallthrough
CT: control target
= control target key end

     0   :  { %s1892_s0 = inlined_call_operand.hbm [shape: f32[2,8,32], index: 0, kind: input, shape index: {}]   ;;  %s1893_s1 = inlined_call_operand.hbm [shape: f32[1,32], index: 1, kind: input, shape index: {}]   ;;  %s1894_s2 = inlined_call_operand.hbm [shape: bf16[2,32,64], index: 2, kind: input, shape index: {}]   ;;  %s1895_s3 = inlined_call_operand.hbm [shape: f32[8,16], index: 3, kind: input, shape index: {}]   ;;  %s1896_s4 = inlined_call_operand.hbm [shape: f32[8,16], index: 4, kind: input, shape index: {}]   ;;  %s1897_s5 = inlined_call_operand.hbm [shape: bf16[2,4,8,16], index: 5, kind: output, shape index: {0}]   ;;  %s1898_s6 = inlined_call_operand.hbm [shape: bf16[2,2,8,16], index: 6, kind: output, shape index: {1}]   ;;  %s1899_s7 = inlined_call_operand.hbm [shape: bf16[2,2,8,16], index: 7, kind: output, shape index: {2}]  }
   0x1   :  { %1922 = sst [smem:[#allocation38_spill]] %s1892_s0 }
   0x2   :  { %1923 = sst [smem:[#allocation39_spill]] %s1893_s1 }
   0x3   :  { %1924 = sst [smem:[#allocation40_spill]] %s1894_s2 }
   0x4   :  { %1925 = sst [smem:[#allocation41_spill]] %s1895_s3 }
   0x5   :  { %1926 = sst [smem:[#allocation42_spill]] %s1896_s4 }
   0x6   :  { %1927 = sst [smem:[#allocation43_spill]] %s1897_s5 }
   0x7   :  { %1928 = sst [smem:[#allocation44_spill]] %s1898_s6 }
   0x8   :  { %1929 = sst [smem:[#allocation45_spill]] %s1899_s7 }
   0x9   :  { %13 = vsyncpa [#allocation4], 0 }
   0xa   :  { %15 = vsyncpa [#allocation4 + $0x1], 0 }
   0xb   :  { %16 = vsyncpa [#allocation7], 0 }
   0xc   :  { %17 = vsyncpa [#allocation11], 0 }
   0xd   :  { %18 = vsyncpa [#allocation5], 0 }
   0xe   :  { %20 = vsyncpa [#allocation5 + $0x1], 0 }
   0xf   :  { %21 = vsyncpa [#allocation14], 0 }
  0x10   :  { %23 = vsyncpa [#allocation14 + $0x1], 0  ;;  %s1530_s24 = smov 0   ;;  %s1532_s25 = smov 0  }
  0x11   :  { %s1534_s26 = smov 0   ;;  %s1536_s27 = smov 0  }
  0x12   :  { %s1538_s28 = smov 0   ;;  %s1540_s29 = smov 0  }
  0x13   :  { %s1542_s30 = smov 0   ;;  %s1544_s8 = smov 0  }
  0x14   :  { %s1546_s9 = smov 0   ;;  %s1548_s10 = smov 0  }
  0x15   :  { %s1550_s11 = smov 0   ;;  %s1552_s12 = smov 0  }
  0x16   :  { %s1554_s13 = smov 0   ;;  %s1556_s14 = smov 0  }
  0x17 LB: > { %1930 = sst [smem:[#allocation23_spill]] %s1419_s24  ;;  %s1599_s15 = sadd.s32 4294967295, %s1471_s14   ;;  %s1471_s14 = sphi %s1556_s14, %s29_s14   ;;  %s1467_s13 = sphi %s1554_s13, %s1998_s13   ;;  %s1463_s12 = sphi %s1552_s12, %s1997_s12   ;;  %s1459_s11 = sphi %s1550_s11, %s1996_s11   ;;  %s1455_s10 = sphi %s1548_s10, %s1995_s10   ;;  %s1451_s9 = sphi %s1546_s9, %s1994_s9   ;;  %s1447_s8 = sphi %s1544_s8, %s1993_s8   ;;  %s1443_s30 = sphi %s1542_s30, %s1992_s30   ;;  %s1439_s29 = sphi %s1540_s29, %s1991_s29   ;;  %s1435_s28 = sphi %s1538_s28, %s1990_s28   ;;  %s1431_s27 = sphi %s1536_s27, %s1980_s27   ;;  %s1427_s26 = sphi %s1534_s26, %s1989_s26   ;;  %s1423_s25 = sphi %s1532_s25, %s1988_s25   ;;  %s1419_s24 = sphi %s1530_s24, %s1979_s24  }
  0x18   : > { %1931 = sst [smem:[#allocation24_spill]] %s1423_s25  ;;  %s1900_s16 = sadd.s32 4294967294, %s1471_s14  }
  0x19   : > { %1932 = sst [smem:[#allocation25_spill]] %s1435_s28  ;;  %p71_p0 = scmp.eq.s32.totalorder %s1599_s15, 0 }
  0x1a   : > { %1933 = sst [smem:[#allocation26_spill]] %s1447_s8  ;;  %p117_p1 = scmp.ne.s32.totalorder %s1435_s28, %s1431_s27 }
  0x1b   : > { %1934 = sst [smem:[#allocation27_spill]] %s1455_s10  ;;  %p196_p2 = scmp.ne.s32.totalorder %s1427_s26, %s1423_s25 }
  0x1c   : > { %1935 = sst [smem:[#allocation28_spill]] %s1459_s11  ;;  %p197_p3 = scmp.eq.s32.totalorder %s1599_s15, 3 }
  0x1d   : > { %1936 = sst [smem:[#allocation29_spill]] %s1463_s12  ;;  %p1609_p4 = por %p117_p1, %p71_p0 }
  0x1e   : > { %1937 = sst [smem:[#allocation30_spill]] %s1467_s13  ;;  %p202_p5 = scmp.ne.s32.totalorder %s1423_s25, %s1419_s24 }
  0x1f   : > { %s1938_s17 = scalar_select %p1609_p4, 1, 0 }
  0x20   : > { %p1615_p6 = por %p197_p3, %p196_p2  ;;  %p203_p7 = scmp.eq.s32.totalorder %s1900_s16, 3 }
  0x21   : > { %1939 = sst [smem:[#allocation31_spill]] %s1938_s17  ;;  %p864_p8 = scmp.ge.s32.totalorder %s1471_s14, 1 }
  0x22   : > { %s1940_s18 = scalar_select %p1615_p6, 1, 0 }
  0x23   : > { %p270_p9 = scmp.lt.s32.totalorder %s1471_s14, 5  ;;  %p1623_p10 = por %p203_p7, %p202_p5 }
  0x24   : > { %1941 = sst [smem:[#allocation32_spill]] %s1940_s18  ;;  %s1473_s27 = smov [#allocation6]  }
  0x25   : > { %s1942_s19 = scalar_select %p1623_p10, 1, 0 }
  0x26   : > { %p1627_p11 = pnand %p864_p8, %p270_p9  ;;  %s1945_s1 = sld [smem:[#allocation39_spill]] }
  0x27   : > { %1943 = sst [smem:[#allocation33_spill]] %s1942_s19  ;;  %s284_s16 = sshll.u32 %s1473_s27, 4  ;;  %s285_s16 = int_to_ptr.vmem [resolvable:$true] %s284_s16 }
  0x28   : > { %p931_p12 = pneg %p1627_p11  ;;  %s41_s21 = sadd.s32 1, %s1463_s12 }
  0x29   : > { %s48_s22 = sadd.s32 1, %s1467_s13  ;;  %p42_p1 = scmp.ge.s32.totalorder %s41_s21, 2 }
  0x2a   : > { %p1638_p13 = pnand %p931_p12, %p71_p0  ;;  %p64_p2 = scmp.ne.s32.totalorder %s1451_s9, %s1447_s8 }
  0x2b   : > { %p65_p3 = scmp.eq.s32.totalorder %s1471_s14, 0  ;;  %s2000_s21 = smov (%p42_p1, %s41_s21), 0 }
  0x2c   : > { %s282_s23 = sshll.u32 %s1945_s1, 4  ;;  %s57_s1 = sadd.s32 1, %s1451_s9  ;;  %s283_s23 = int_to_ptr.hbm [resolvable:$true] %s282_s23 }
  0x2d   : > { %934 = dma.hbm_to_vmem [thread:$0]  (!%p1638_p13), %s283_s23, 16, %s285_s16, [#allocation7]  }
  0x2e   : > { %1947 = sst [smem:[#allocation34_spill]] %s2000_s21  ;;  %s2002_s22 = smov (!%p42_p1, %s48_s22), %s1467_s13 }
  0x2f   : > { %p1655_p5 = por %p65_p3, %p64_p2  ;;  %p70_p7 = scmp.ne.s32.totalorder %s1447_s8, %s1443_s30 }
  0x30   : > { %p50_p8 = scmp.ge.s32.totalorder %s2002_s22, 2  ;;  %s101_s23 = ssub.s32 %s1463_s12, %s2000_s21 }
  0x31   : > { %p1665_p9 = por %p71_p0, %p70_p7  ;;  %p102_p12 = scmp.eq.s32.totalorder %s101_s23, 0 }
  0x32   : > { %s2004_s22 = smov (%p50_p8, %s2002_s22), 0  ;;  %s104_s24 = sadd.s32 1, %s1439_s29 }
  0x33   : > { %s1949_s27 = scalar_select %p1665_p9, 1, 0 }
  0x34   : > { %1951 = sst [smem:[#allocation36_spill]] %s2004_s22  ;;  %p111_p1 = scmp.ne.s32.totalorder %s1439_s29, %s1435_s28 }
  0x35   : > { %1950 = sst [smem:[#allocation35_spill]] %s1949_s27  ;;  %s52_s5 = ssub.s32 %s1467_s13, %s2004_s22 }
  0x36   : > { %s186_s18 = sadd.s32 1, %s1427_s26  ;;  %p55_p2 = scmp.eq.s32.totalorder %s52_s5, 0 }
  0x37   : > { %p1679_p10 = por %p111_p1, %p65_p3  ;;  %s181_s6 = sor.u32 %s101_s23, %s52_s5 }
  0x38   : > { %s1684_s21 = scalar_select %p102_p12, %s1439_s29, %s104_s24  }
  0x39   : > { %s1687_s7 = scalar_select %p55_p2, %s1451_s9, %s57_s1  }
  0x3a   : > { %1953 = sst [smem:[#allocation37_spill]] %s1684_s21  ;;  %p961_p7 = scmp.lt.s32.totalorder %s1471_s14, 4 }
  0x3b   : > { %p184_p8 = scmp.eq.s32.totalorder %s181_s6, 0  ;;  %s323_s11 = sand.u32 1, %s1471_s14  }
  0x3c   : > { %s325_s22 = sand.u32 1, %s1451_s9   ;;  %s870_s17 = sshll.u32 %s1467_s13, 3 }
  0x3d   : > { %s1693_s10 = scalar_select %p184_p8, %s1427_s26, %s186_s18  }
  0x3e   : > { %s869_s25 = sshll.u32 %s325_s22, 3  ;;  %s1954_s0 = sld [smem:[#allocation38_spill]] }
  0x3f   : > { %s327_s8 = scalar_lea.vmem [#allocation3], %s869_s25  ;;  %p942_p3 = pnand %p961_p7, %p1655_p5 }
  0x40   : > { %s336_s1 = sshll.u32 %s327_s8, 4  ;;  %p1707_p12 = pnand %p961_p7, %p1679_p10  ;;  %s337_s1 = int_to_ptr.vmem [resolvable:$true] %s336_s1 }
  0x41   : > { %s1956_s3 = sld [smem:[#allocation41_spill]]  ;;  %s324_s25 = scalar_lea.sflag [#allocation4], %s323_s11 }
  0x42   : > { %s1474_s8 = smov [#allocation9]   ;;  %s1957_s4 = sld [smem:[#allocation42_spill]] }
  0x43   : > { %s1475_s27 = smov [#allocation10]   ;;  %s906_s11 = sshll.u32 %s1463_s12, 4 }
  0x44   : > { %s332_s24 = scalar_lea.hbm %s1954_s0, %s870_s17  ;;  %s298_s17 = sshll.u32 %s1474_s8, 4  ;;  %s299_s17 = int_to_ptr.vmem [resolvable:$true] %s298_s17 }
  0x45   : > { %s334_s21 = sshll.u32 %s332_s24, 4  ;;  %s312_s30 = sshll.u32 %s1475_s27, 4  ;;  %s335_s21 = int_to_ptr.hbm [resolvable:$true] %s334_s21  ;;  %s313_s30 = int_to_ptr.vmem [resolvable:$true] %s312_s30 }
  0x46   : > { %944 = dma.hbm_to_vmem [thread:$0]  (!%p942_p3), %s335_s21, 128, %s337_s1, %s324_s25  }
  0x47   : > { %s296_s28 = sshll.u32 %s1956_s3, 4  ;;  %s345_s24 = sand.u32 1, %s1439_s29   ;;  %s297_s28 = int_to_ptr.hbm [resolvable:$true] %s296_s28 }
  0x48   : > { %s310_s23 = sshll.u32 %s1957_s4, 4  ;;  %s871_s6 = sshll.u32 %s345_s24, 4  ;;  %s311_s23 = int_to_ptr.hbm [resolvable:$true] %s310_s23 }
  0x49   : > { %937 = dma.hbm_to_vmem [thread:$0]  (!%p1638_p13), %s297_s28, 128, %s299_s17, [#allocation7]  }
  0x4a   : > { %940 = dma.hbm_to_vmem [thread:$0]  (!%p1638_p13), %s311_s23, 128, %s313_s30, [#allocation11]  }
  0x4b   : > { %s1958_s2 = sld [smem:[#allocation40_spill]]  ;;  %s347_s8 = scalar_lea.vmem [#allocation8], %s871_s6 }
  0x4c   : > { %s355_s0 = sshll.u32 %s347_s8, 4  ;;  %s1476_s28 = smov 64   ;;  %s356_s0 = int_to_ptr.vmem [resolvable:$true] %s355_s0 }
  0x4d   : > { %s1477_s17 = smov 4   ;;  %s1959_s19 = sld [smem:[#allocation26_spill]] (!%p1627_p11) }
  0x4e   : > { %s1919_s23 = sand.u32 (!%p1627_p11), 1, %s1599_s15  }
  0x4f   : > { %367 = sbr.rel (%p1627_p11) target bundleno = 759 (0x2f7), region = 40  ;;  %s370_s24 = scalar_lea.sflag (!%p1627_p11), [#allocation4], %s1919_s23 }
  0x51   : > { %s352_s18 = scalar_lea.hbm %s1958_s2, %s906_s11 }
  0x52   : > { %s353_s22 = sshll.u32 %s352_s18, 4  ;;  %s354_s22 = int_to_ptr.hbm [resolvable:$true] %s353_s22 }
  0x53   : > { %947 = dma.hbm_to_vmem [thread:$0]  (!%p1707_p12), %s354_s22, 256, %s356_s0, %s324_s25, %s1476_s28, %s1476_s28, %s1477_s17  }
  0x54   : > { %s371_s27 = sand.u32 1, %s1959_s19  }
  0x55   : > { %s875_s30 = sshll.u32 %s371_s27, 3 }
  0x56   : > { %s373_s6 = scalar_lea.vmem [#allocation3], %s875_s30 }
  0x57   : > { %1390 = dma.done.wait (%p1665_p9), %s370_s24, 128  }
  0x58   : > { %1392 = vsyncadd (%p1665_p9), %s370_s24, 4294967168 }
  0x59   : > { %1394 = dma.done.wait (%p71_p0), [#allocation7], 16  }
  0x5a   : > { %1396 = vsyncadd (%p71_p0), [#allocation7], 4294967280  ;;  %s1961_s0 = sld [smem:[#allocation25_spill]] }
  0x60   : > { %s386_s5 = sand.u32 1, %s1961_s0  }
  0x61   : > { %s1743_s25 = sshll.u32 %s386_s5, 4 }
  0x62   : > { %s388_s11 = scalar_lea.vmem [#allocation8], %s1743_s25 }
  0x63   : > { %1398 = dma.done.wait (%p1609_p4), %s370_s24, 256  }
  0x64   : > { %1400 = vsyncadd (%p1609_p4), %s370_s24, 4294967040 }
  0x65   : > { %1402 = dma.done.wait (%p71_p0), [#allocation7], 128  }
  0x66   : > { %1404 = vsyncadd (%p71_p0), [#allocation7], 4294967168 }
  0x67   : > { %1406 = dma.done.wait (%p71_p0), [#allocation11], 128  }
  0x68   : > { %1408 = vsyncadd (%p71_p0), [#allocation11], 4294967168  ;;  %s1963_s21 = sld [smem:[#allocation24_spill]] }
  0x69   : > { %s1964_s19 = sld [smem:[#allocation27_spill]] }
  0x6e   : > { %s1759_s1 = sand.u32 1, %s1963_s21  }
  0x6f   : > { %s880_s18 = sshll.u32 %s1759_s1, 3  ;;  %s881_s8 = sshll.u32 %s1759_s1, 2 }
  0x70   : > { %s1763_s22 = scalar_lea.vmem [#allocation12], %s880_s18  ;;  %s1765_s28 = scalar_lea.vmem [#allocation13], %s881_s8 }
  0x71   : > { %s1767_s17 = scalar_lea.vmem [#allocation15], %s881_s8  ;;  %p883_p4 = scmp.ne.s32.totalorder %s1964_s19, 0 }
  0x73   : > { %450 = sbr.rel (%p883_p4) target bundleno = 269 (0x10d), region = 64 }
  0x78   : > { %v451_v0 = vld [vmem:[%s373_s6] sm:$0xff]  ;;  %vm453_vm0 = vcmask 261120   ;;  %v1478_v3 = vmov 32.0   ;;  %v477_v16 = vld [vmem:[#allocation6] sm:$0x1]  ;;  %vm484_vm5 = vcmask 257024  }
  0x79   : > { %v452_v1 = vmul.f32 %v451_v0, %v451_v0  ;;  %1095 = vrcp.f32 %v1478_v3  ;;  %v478_v18 = vadd.f32 1.0, %v477_v16 }
  0x7b   : > { %v454_v2 = vsel %vm453_vm0, %v452_v1, 0.0  ;;  %v480_v21 = vperm.slane %v478_v18, 0 }
  0x7c   : > { %455 = vadd.xlane.f32.xlu0 %v454_v2 }
  0x7f   : > { %v1096_v4 = vpop.eup %1095 }
  0x80   : > { %v458_v5 = vmul.f32 32.0, %v1096_v4  ;;  %vm462_vm1 = vweird.f32 %v1096_v4 }
  0x82   : > { %v459_v6 = vsub.f32 1.0, %v458_v5 }
  0x84   : > { %v460_v7 = vmul.f32 %v1096_v4, %v459_v6 }
  0x86   : > { %v461_v8 = vadd.f32 %v1096_v4, %v460_v7 }
  0x88   : > { %v463_v9 = vsel %vm462_vm1, %v1096_v4, %v461_v8 }
  0xef   : > { %v456_v10 = vpop.xlane.xlu0 %455 }
  0xf0   : > { %v464_v11 = vmul.f32 %v463_v9, %v456_v10 }
  0xf2   : > { %v465_v12 = vadd.f32 1e-05, %v464_v11 }
  0xf4   : > { %1097 = vrsqrt.f32 %v465_v12  ;;  %vm472_vm3 = vweird.f32 %v465_v12 }
  0xfa   : > { %v1098_v13 = vpop.eup %1097 }
  0xfb   : > { %v467_v14 = vmul.f32 %v1098_v13, %v465_v12  ;;  %vm473_vm2 = vweird.f32 %v1098_v13 }
  0xfc   : > { %vm474_vm4 = vmor %vm472_vm3, %vm473_vm2 }
  0xfd   : > { %v468_v15 = vmul.f32 %v1098_v13, %v467_v14 }
  0xff   : > { %v469_v17 = vmul.f32 0.5, %v468_v15 }
 0x101   : > { %v470_v19 = vsub.f32 1.5, %v469_v17 }
 0x103   : > { %v471_v20 = vmul.f32 %v1098_v13, %v470_v19 }
 0x105   : > { %v475_v22 = vsel %vm474_vm4, %v1098_v13, %v471_v20 }
 0x106   : > { %v476_v23 = vmul.f32 %v475_v22, %v451_v0 }
 0x108   : > { %v482_v24 = vmul.f32 %v480_v21, %v476_v23 }
 0x10a   : > { %v483_v25 = vpack.c.bf16 %v482_v24, %v482_v24 }
 0x10c   : > { %485 = vst.msk [vmem:[#allocation2] sm:$0xf] %vm484_vm5, %v483_v25 }
 0x10d PF: > { %v908_v26 = vld [vmem:[%s388_s11 + $0x8] sm:$0xff]  ;;  %v520_v27 = vld [vmem:[#allocation9] sm:$0xff]  ;;  %s1479_s16 = smov 16   ;;  %vm503_vm6 = vcmask 261120   ;;  %s1480_s27 = smov 120   ;;  %vm529_vm7 = vcmask 64512  }
 0x10e   : > { %513 = vmatpush.bf16.msra.mxu0 %v908_v26  ;;  %v907_v28 = vld [vmem:[%s388_s11] sm:$0xff]  ;;  %542 = vrot.lane.b32.xlu2 %v520_v27, %s1479_s16  ;;  %s1481_s30 = smov 104   ;;  %s1482_s24 = smov 32   ;;  %v521_v33 = vld [vmem:[#allocation10] sm:$0xff]  ;;  %vm535_vm8 = vcmask 125952  }
 0x10f   : > { %s1483_s6 = smov 88   ;;  %s1484_s0 = smov 8  }
 0x110   : > { %s1485_s20 = smov 80   ;;  %s1965_s5 = sld [smem:[#allocation28_spill]] }
 0x111   : > { %s1966_s25 = sld [smem:[#allocation27_spill]]  ;;  %s1486_s11 = smov 96  }
 0x112   : > { %514 = vmatpush.bf16.msra.mxu0 %v907_v28  ;;  %s1487_s21 = smov 112   ;;  %s1969_s23 = sld [smem:[#allocation45_spill]] }
 0x113   : > { %v486_v29 = vld [vmem:[#allocation2] sm:$0xf]  ;;  %s631_s3 = sshll.u32 %s1765_s28, 4  ;;  %s648_s13 = sshll.u32 %s1767_s17, 4  ;;  %s632_s3 = int_to_ptr.vmem [resolvable:$true] %s631_s3  ;;  %s1788_s13 = int_to_ptr.vmem [resolvable:$true] %s648_s13 }
 0x115   : > { %892 = vmatmul.msk.bf16.vlgmr.msra.gmra.mxu0 %vm503_vm6, %v486_v29 }
 0x116   : > { %s900_s18 = sshll.u32 %s1965_s5, 1 }
 0x117   : > { %s627_s8 = sadd.s32 %s1966_s25, %s900_s18 }
 0x118   : > { %s901_s19 = sshll.u32 %s627_s8, 2 }
 0x119   : > { %s646_s2 = scalar_lea.hbm %s1969_s23, %s901_s19 }
 0x11a   : > { %s650_s12 = sshll.u32 %s646_s2, 4  ;;  %s1790_s12 = int_to_ptr.hbm [resolvable:$true] %s650_s12 }
 0x168   : > { %v543_v49 = vpop.permute.xlu2 %542 }
 0x192   : > { %v516_v30 = vpop.f32.mrf.mxu0 }
 0x193   : > { %523 = vrot.lane.b32.xlu1 %v516_v30, %s1480_s27  ;;  %537 = vrot.lane.b32.xlu0 %v516_v30, %s1481_s30  ;;  %v579_v32 = vpack.c.bf16 %v516_v30, %v516_v30  ;;  %v531_v44 = vmul.f32 %v520_v27, %v516_v30  ;;  %v545_v54 = vmul.f32 %v543_v49, %v516_v30  ;;  %s1967_s30 = sld [smem:[#allocation44_spill]] }
 0x19a   : > { %v518_v31 = vpop.f32.mrf.mxu0 }
 0x19b   : > { %563 = vrot.lane.b32.xlu1 %v520_v27, %s1482_s24  ;;  %559 = vrot.lane.b32.xlu0 %v516_v30, %s1483_s6  ;;  %s1968_s6 = smov %s1967_s30 }
 0x1a3   : > { %526 = vrot.lane.b32.xlu1 %v516_v30, %s1484_s0 }
 0x1ab   : > { %581 = vrot.lane.b32.xlu1 %v579_v32, %s1485_s20 }
 0x205   : > { %v524_v34 = vpop.permute.xlu1 %523  ;;  %v538_v35 = vpop.permute.xlu0 %537 }
 0x206   : > { %v540_v36 = vsel %vm529_vm7, %v538_v35, %v524_v34 }
 0x207   : > { %v546_v37 = vmul.f32 %v540_v36, %v521_v33 }
 0x209   : > { %548 = vrot.lane.b32.xlu0 %v546_v37, %s1479_s16 }
 0x20d   : > { %v564_v38 = vpop.permute.xlu1 %563  ;;  %v560_v39 = vpop.permute.xlu0 %559 }
 0x20e   : > { %v562_v40 = vsel %vm529_vm7, %v560_v39, %v538_v35  ;;  %v566_v50 = vmul.f32 %v564_v38, %v516_v30 }
 0x20f   : > { %v567_v41 = vmul.f32 %v562_v40, %v521_v33 }
 0x211   : > { %569 = vrot.lane.b32.xlu2 %v567_v41, %s1482_s24  ;;  %s629_s24 = scalar_lea.hbm %s1967_s30, %s901_s19  ;;  %s1269_s19 = scalar_lea.hbm %s1968_s6, 16 }
 0x212   : > { %s633_s4 = sshll.u32 %s629_s24, 4  ;;  %s634_s4 = int_to_ptr.hbm [resolvable:$true] %s633_s4 }
 0x213   : > { %s1263_s8 = sshra.s32 %s634_s4, 4  ;;  %s1264_s8 = int_to_ptr.hbm [resolvable:$true] %s1263_s8 }
 0x214   : > { %s1265_s16 = scalar_lea.hbm %s1264_s8, 4  ;;  %p1270_p13 = scmp.lt.s32.totalorder %s1264_s8, %s1968_s6 }
 0x215   : > { %v527_v42 = vpop.permute.xlu1 %526  ;;  %p1266_p0 = scmp.ne.s32.totalorder %s1264_s8, %s1265_s16  ;;  %p1271_p5 = scmp.lt.s32.totalorder %s1269_s19, %s1265_s16 }
 0x216   : > { %v530_v43 = vsel %vm529_vm7, %v524_v34, %v527_v42 }
 0x217   : > { %v532_v45 = vmul.f32 %v530_v43, %v521_v33  ;;  %p1267_p10 = pnand %p1266_p0, %p1615_p6  ;;  %p1272_p9 = por %p1271_p5, %p1270_p13 }
 0x219   : > { %v533_v46 = vadd.f32 %v532_v45, %v531_v44  ;;  %p1268_p11 = pneg %p1267_p10 }
 0x21b   : > { %v534_v47 = vpack.c.bf16 %v533_v46, %v533_v46  ;;  %p1273_p1 = pnand %p1272_p9, %p1268_p11 }
 0x21d   : > { %v582_v48 = vpop.permute.xlu1 %581  ;;  %536 = vst.msk [vmem:[%s1763_s22] sm:$0xf] %vm535_vm8, %v534_v47 }
 0x21e   : > { %584 = vst.msk [vmem:[%s1767_s17] sm:$0xf] %vm535_vm8, %v582_v48 }
 0x26b   : > { %v570_v51 = vpop.permute.xlu2 %569 }
 0x26c   : > { %v572_v52 = vadd.f32 %v570_v51, %v566_v50 }
 0x26e   : > { %v573_v53 = vpack.c.bf16 %v572_v52, %v572_v52 }
 0x270   : > { %575 = vrot.lane.b32.xlu2 %v573_v53, %s1486_s11 }
 0x27b   : > { %v549_v55 = vpop.permute.xlu0 %548 }
 0x27c   : > { %v551_v56 = vadd.f32 %v549_v55, %v545_v54 }
 0x27e   : > { %v552_v57 = vpack.c.bf16 %v551_v56, %v551_v56 }
 0x280   : > { %554 = vrot.lane.b32.xlu0 %v552_v57, %s1487_s21  ;;  %s1971_s21 = sand.u32 1, %s1599_s15  }
 0x281   : > { %s591_s18 = scalar_lea.sflag [#allocation14], %s1971_s21 }
 0x2ca   : > { %v576_v58 = vpop.permute.xlu2 %575 }
 0x2cb   : > { %578 = vst.msk [vmem:[%s1765_s28] sm:$0xf] %vm535_vm8, %v576_v58 }
 0x2cc   : > { %1276 = shalt.err (!%p1273_p1)
}
 0x2cd   : > { %926 = dma.vmem_to_hbm [thread:$0]  (%p1615_p6), %s632_s3, 64, %s634_s4, %s591_s18  }
 0x2ce   : > { %s1291_s15 = sshra.s32 %s1790_s12, 4  ;;  %s1297_s20 = scalar_lea.hbm %s1969_s23, 16  ;;  %s1292_s15 = int_to_ptr.hbm [resolvable:$true] %s1291_s15 }
 0x2cf   : > { %s1293_s28 = scalar_lea.hbm %s1292_s15, 4  ;;  %p1298_p3 = scmp.lt.s32.totalorder %s1292_s15, %s1969_s23 }
 0x2d0   : > { %p1294_p2 = scmp.ne.s32.totalorder %s1292_s15, %s1293_s28  ;;  %p1299_p12 = scmp.lt.s32.totalorder %s1297_s20, %s1293_s28 }
 0x2d2   : > { %p1295_p7 = pnand %p1294_p2, %p1615_p6  ;;  %p1300_p4 = por %p1299_p12, %p1298_p3 }
 0x2d4   : > { %p1296_p8 = pneg %p1295_p7 }
 0x2d6   : > { %p1301_p0 = pnand %p1300_p4, %p1296_p8 }
 0x2d8   : > { %1304 = shalt.err (!%p1301_p0)
}
 0x2d9   : > { %927 = dma.vmem_to_hbm [thread:$0]  (%p1615_p6), %s1788_s13, 64, %s1790_s12, %s591_s18  }
 0x2da   : > { %s897_s3 = sshll.u32 %s1966_s25, 1  ;;  %s898_s4 = sshll.u32 %s1965_s5, 2 }
 0x2db   : > { %s608_s16 = sadd.s32 %s898_s4, %s897_s3  ;;  %s1972_s27 = sld [smem:[#allocation43_spill]] }
 0x2dc   : > { %s899_s17 = sshll.u32 %s608_s16, 2  ;;  %s611_s28 = sshll.u32 %s1763_s22, 4  ;;  %s612_s28 = int_to_ptr.vmem [resolvable:$true] %s611_s28 }
 0x2dd   : > { %s586_s0 = scalar_lea.sflag [#allocation5], %s1759_s1 }
 0x2e1   : > { %s1973_s15 = smov %s1972_s27  ;;  %s610_s30 = scalar_lea.hbm %s1972_s27, %s899_s17 }
 0x2e2   : > { %s613_s24 = sshll.u32 %s610_s30, 4  ;;  %s1325_s25 = scalar_lea.hbm %s1973_s15, 32  ;;  %s614_s24 = int_to_ptr.hbm [resolvable:$true] %s613_s24 }
 0x2e3   : > { %s1319_s20 = sshra.s32 %s614_s24, 4  ;;  %s1320_s20 = int_to_ptr.hbm [resolvable:$true] %s1319_s20 }
 0x2e4   : > { %s1321_s12 = scalar_lea.hbm %s1320_s20, 8  ;;  %p1326_p5 = scmp.lt.s32.totalorder %s1320_s20, %s1973_s15 }
 0x2e5   : > { %p1322_p10 = scmp.ne.s32.totalorder %s1320_s20, %s1321_s12  ;;  %p1327_p9 = scmp.lt.s32.totalorder %s1325_s25, %s1321_s12 }
 0x2e7   : > { %p1323_p11 = pnand %p1322_p10, %p1615_p6  ;;  %p1328_p1 = por %p1327_p9, %p1326_p5 }
 0x2e9   : > { %p1324_p13 = pneg %p1323_p11 }
 0x2eb   : > { %p1329_p2 = pnand %p1328_p1, %p1324_p13 }
 0x2f2   : > { %v555_v59 = vpop.permute.xlu0 %554 }
 0x2f3   : > { %893 = vst.msk [vmem:[%s1763_s22 + $0x4] sm:$0xf] %vm535_vm8, %v555_v59 }
 0x2f4   : > { %1332 = shalt.err (!%p1329_p2)
}
 0x2f5   : > { %s1488_s1 = smov 64   ;;  %s1489_s22 = smov 4  }
 0x2f6   : > { %925 = dma.vmem_to_hbm [thread:$0]  (%p1615_p6), %s612_s28, 128, %s614_s24, %s586_s0, %s1488_s1, %s1488_s1, %s1489_s22  }
 0x2f7 PF: > { %s1974_s8 = sld [smem:[#allocation23_spill]]  ;;  %p965_p7 = scmp.ge.s32.totalorder %s1471_s14, 2 }
 0x2f8   : > { %s1975_s3 = sld [smem:[#allocation33_spill]] }
 0x2fd   : > { %s662_s4 = sand.u32 1, %s1974_s8  }
 0x2fe   : > { %p1976_p8 = scmp.ne.s32.totalorder %s1975_s3, 0  ;;  %s663_s16 = scalar_lea.sflag [#allocation5], %s662_s4 }
 0x300   : > { %p949_p3 = pnand %p965_p7, %p1976_p8 }
 0x302   : > { %p950_p12 = pneg %p949_p3 }
 0x304   : > { %1410 = dma.done.wait (%p950_p12), %s663_s16, 128  }
 0x305   : > { %1412 = vsyncadd (%p950_p12), %s663_s16, 4294967168  ;;  %s1977_s17 = sadd.s32 4294967294, %s1471_s14  }
 0x306   : > { %s672_s2 = sand.u32 1, %s1977_s17  }
 0x307   : > { %s673_s19 = scalar_lea.sflag [#allocation14], %s672_s2 }
 0x308   : > { %1414 = dma.done.wait (%p950_p12), %s673_s19, 128  }
 0x309   : > { %1416 = vsyncadd (%p950_p12), %s673_s19, 4294967168  ;;  %s29_s14 = sadd.s32 1, %s1471_s14   ;;  %s1979_s24 = sld [smem:[#allocation24_spill]] }
 0x30a   : > { %p1845_p6 = scmp.ge.s32.totalorder %s29_s14, 6   ;;  %s1980_s27 = sld [smem:[#allocation25_spill]] }
 0x30b   : > { %s1981_s30 = sld [smem:[#allocation37_spill]]  ;;  %s1988_s25 = smov %s1427_s26 }
 0x30c   : > { %s1982_s0 = sld [smem:[#allocation26_spill]]  ;;  %s1989_s26 = smov %s1693_s10 }
 0x30d   : > { %s1983_s20 = sld [smem:[#allocation29_spill]]  ;;  %s1990_s28 = smov %s1439_s29 }
 0x30e   : > { %s1984_s12 = sld [smem:[#allocation30_spill]]  ;;  %s1993_s8 = smov %s1451_s9 }
 0x30f   : > { %s1985_s13 = sld [smem:[#allocation34_spill]]  ;;  %s1994_s9 = smov %s1687_s7 }
 0x310   : > { %s1986_s5 = sld [smem:[#allocation36_spill]] }
 0x311   : > { %s1991_s29 = smov %s1981_s30 }
 0x312   : > { %s1992_s30 = smov %s1982_s0  ;;  %28 = sbr.rel (!%p1845_p6) target bundleno = 23 (0x17), region = 147 }
 0x313   : > { %s1995_s10 = smov %s1983_s20 }
 0x314   : > { %s1996_s11 = smov %s1984_s12 }
 0x315   : > { %s1997_s12 = smov %s1985_s13 }
 0x316   : > { %s1998_s13 = smov %s1986_s5 }
 0x317   :  { %689 = vsyncpa [#allocation4], 1 }
 0x318   :  { %691 = vsyncpa [#allocation4 + $0x1], 1 }
 0x319   :  { %692 = vsyncpa [#allocation7], 1 }
 0x31a   :  { %693 = vsyncpa [#allocation11], 1 }
 0x31b   :  { %694 = vsyncpa [#allocation5], 1 }
 0x31c   :  { %696 = vsyncpa [#allocation5 + $0x1], 1 }
 0x31d   :  { %697 = vsyncpa [#allocation14], 1 }
 0x31e   :  { %699 = vsyncpa [#allocation14 + $0x1], 1 }

</bundles_post_ra>
